<compile_context>
chip_gen: v7x
topology: tpu7x:2x2x1
jax: 0.10.0
libtpu: 0.0.40
codegen_flags: <defaults>
</compile_context>

<pallas_src>
import functools

import jax
import jax.numpy as jnp
from jax.experimental import pallas as pl
from jax.experimental.pallas import tpu as pltpu


_EPS_NORM = 1e-4   # matches `norm()` helper in deconfnet.py
_BN_EPS = 1e-5     # torch.nn.BatchNorm1d default eps


def _round_up(v, m):
    return (v + m - 1) // m * m


def _godin_kernel(x_ref, wt_ref, den_ref, *refs, emit_numerators):
    """Per (batch-tile i, K-tile k):
         acc += x_tile @ w_nt_tile          (MXU, K-major rhs, no transpose)
         ssq += sum(x_tile**2, axis=-1)     (row ||x||^2 partials)
       at last k:
         numerators = acc / (sqrt(ssq) + 1e-4)
         quotients  = numerators / denominators
    """
    if emit_numerators:
        quot_ref, num_ref, acc_ref, ssq_ref = refs
    else:
        quot_ref, acc_ref, ssq_ref = refs
        num_ref = None

    k = pl.program_id(1)

    @pl.when(k == 0)
    def _():
        acc_ref[...] = jnp.zeros_like(acc_ref)
        ssq_ref[...] = jnp.zeros_like(ssq_ref)

    x = x_ref[...].astype(jnp.float32)                       # (TB, TK)
    acc_ref[...] += jnp.dot(x, wt_ref[...].astype(jnp.float32),
                            preferred_element_type=jnp.float32)   # (TB, C_pad)
    ssq_ref[...] += jnp.sum(x * x, axis=-1, keepdims=True)   # (TB, 1)

    @pl.when(k == pl.num_programs(1) - 1)
    def _():
        inv_xnorm = 1.0 / (jnp.sqrt(ssq_ref[...]) + _EPS_NORM)    # (TB, 1)
        numerators = acc_ref[...] * inv_xnorm                     # (TB, C_pad)
        den = den_ref[...].astype(jnp.float32)                    # (TB, 1)
        quot_ref[...] = (numerators / den).astype(quot_ref.dtype)
        if emit_numerators:
            num_ref[...] = numerators.astype(num_ref.dtype)


def _godin_pallas(x, w_nt, denominators, num_classes, emit_numerators):
    """x: (B, F) raw input; w_nt: (F, C) row-normalized weight, pre-transposed;
    denominators: (B, 1). Returns (quotients[, numerators]) sliced back to (B, C)."""
    B, F = x.shape
    C = num_classes

    # ---- tile-aligned padded shapes: (8,128)-aligned blocks, lane-dense C ----
    B8 = _round_up(B, 8)
    TB = B8 if B8 <= 256 else 256
    B_pad = _round_up(B, TB)

    F128 = _round_up(F, 128)
    TK = F128 if F128 <= 512 else 512
    F_pad = _round_up(F, TK)

    C_pad = _round_up(C, 128)

    x_p = x if (B_pad, F_pad) == (B, F) else (
        jnp.zeros((B_pad, F_pad), x.dtype).at[:B, :F].set(x))
    w_p = w_nt if (F_pad, C_pad) == (F, C) else (
        jnp.zeros((F_pad, C_pad), w_nt.dtype).at[:F, :C].set(w_nt))
    den_p = denominators if B_pad == B else (
        jnp.ones((B_pad, 1), denominators.dtype).at[:B, :].set(denominators))

    grid = (B_pad // TB, F_pad // TK)

    out_shape = [jax.ShapeDtypeStruct((B_pad, C_pad), x.dtype)]
    out_specs = [pl.BlockSpec((TB, C_pad), lambda i, k: (i, 0))]
    if emit_numerators:
        out_shape.append(jax.ShapeDtypeStruct((B_pad, C_pad), x.dtype))
        out_specs.append(pl.BlockSpec((TB, C_pad), lambda i, k: (i, 0)))

    outs = pl.pallas_call(
        functools.partial(_godin_kernel, emit_numerators=emit_numerators),
        out_shape=tuple(out_shape),
        grid_spec=pltpu.PrefetchScalarGridSpec(
            num_scalar_prefetch=0,
            grid=grid,
            in_specs=[
                pl.BlockSpec((TB, TK), lambda i, k: (i, k)),      # x tile
                pl.BlockSpec((TK, C_pad), lambda i, k: (k, 0)),   # normalized W^T tile
                pl.BlockSpec((TB, 1), lambda i, k: (i, 0)),       # denominators tile
            ],
            out_specs=out_specs,
            scratch_shapes=[
                pltpu.VMEM((TB, C_pad), jnp.float32),   # matmul accumulator
                pltpu.VMEM((TB, 1), jnp.float32),       # sum-of-squares accumulator
            ],
        ),
        compiler_params=pltpu.CompilerParams(
            dimension_semantics=("parallel", "arbitrary"),  # batch || (megacore), K reduction
            vmem_limit_bytes=48 * 1024 * 1024,              # within v7x's 64 MiB physical VMEM
        ),
    )(x_p, w_p, den_p)

    if emit_numerators:
        quot_p, num_p = outs
        return quot_p[:B, :C], num_p[:B, :C]
    (quot_p,) = outs
    return quot_p[:B, :C], None


@functools.partial(jax.jit, static_argnames=("training", "use_pallas"))
def godin_forward(x, h_weight, g_weight, g_bias,
                  bn_gamma, bn_beta, bn_running_mean, bn_running_var,
                  training=True, use_pallas=None):
    """Pallas implementation of GodinLayer.forward.

    x:         (B, in_features) f32
    h_weight:  (num_classes, in_features) f32   (no bias)
    g_weight:  (1, in_features), g_bias: (1,)
    bn_*:      BatchNorm1d(1) params / running stats, shape (1,)
    """
    B, F = x.shape
    C = h_weight.shape[0]

    # ---- g branch: Linear(F,1) -> BatchNorm1d(1) -> Sigmoid. Tiny, and training-mode
    # BatchNorm needs global batch statistics, so it stays in plain JAX. ----
    # TODO(synk): training-mode BatchNorm batch statistics are a global-batch reduction,
    # computed here in the wrapper rather than inside the batch-tiled Pallas grid.
    z = x @ g_weight.T + g_bias                                 # (B, 1)
    if training:
        mean = jnp.mean(z, axis=0)
        var = jnp.var(z, axis=0)                                # biased, like torch BN
    else:
        mean, var = bn_running_mean, bn_running_var
    z_hat = (z - mean) * jax.lax.rsqrt(var + _BN_EPS)
    denominators = jax.nn.sigmoid(z_hat * bn_gamma + bn_beta)   # (B, 1)

    # ---- weight row-normalization + pre-transpose (once per call, outside hot loop) ----
    w_rownorm = jnp.sqrt(jnp.sum(h_weight * h_weight, axis=1, keepdims=True))
    w_nt = (h_weight / (w_rownorm + _EPS_NORM)).T               # (F, C), K-major for MXU

    if use_pallas is None:
        # Tiny problems: Pallas launch/grid overhead dwarfs compute; let XLA fuse it.
        use_pallas = (B * F * C) >= (1 << 20)

    if use_pallas:
        quotients, numerators = _godin_pallas(
            x, w_nt, denominators, C, emit_numerators=not training)
    else:
        x_rownorm = jnp.sqrt(jnp.sum(x * x, axis=1, keepdims=True))
        x_n = x / (x_rownorm + _EPS_NORM)
        numerators = x_n @ w_nt
        quotients = numerators / denominators

    if training:
        return quotients
    return quotients, numerators, denominators


def init_godin_params(key, in_features, num_classes, dtype=jnp.float32):
    """Matches the PyTorch module's init: h.weight kaiming_normal_(relu) (no bias),
    g.Linear default uniform init, BatchNorm1d(1) gamma=1/beta=0, running stats 0/1."""
    k_h, k_gw, k_gb = jax.random.split(key, 3)
    std = jnp.sqrt(2.0 / in_features)                           # relu gain / sqrt(fan_in)
    h_weight = std * jax.random.normal(k_h, (num_classes, in_features), dtype)
    bound = 1.0 / jnp.sqrt(jnp.asarray(in_features, jnp.float32))
    g_weight = jax.random.uniform(k_gw, (1, in_features), dtype, -bound, bound)
    g_bias = jax.random.uniform(k_gb, (1,), dtype, -bound, bound)
    bn_gamma = jnp.ones((1,), dtype)
    bn_beta = jnp.zeros((1,), dtype)
    bn_running_mean = jnp.zeros((1,), dtype)
    bn_running_var = jnp.ones((1,), dtype)
    return (h_weight, g_weight, g_bias,
            bn_gamma, bn_beta, bn_running_mean, bn_running_var)


def godin_reference(x, h_weight, g_weight, g_bias, bn_gamma, bn_beta,
                    bn_running_mean, bn_running_var, training):
    """Plain-JAX reference mirroring the PyTorch forward exactly."""
    z = x @ g_weight.T + g_bias
    if training:
        mean, var = jnp.mean(z, axis=0), jnp.var(z, axis=0)
    else:
        mean, var = bn_running_mean, bn_running_var
    den = jax.nn.sigmoid((z - mean) / jnp.sqrt(var + _BN_EPS) * bn_gamma + bn_beta)
    x_n = x / (jnp.linalg.norm(x, axis=1, keepdims=True) + _EPS_NORM)
    w_n = h_weight / (jnp.linalg.norm(h_weight, axis=1, keepdims=True) + _EPS_NORM)
    num = x_n @ w_n.T
    quot = num / den
    return quot, num, den


if __name__ == "__main__":
    key = jax.random.PRNGKey(0)
    k_x, k_p = jax.random.split(key)

    batch, in_features, num_classes = 8, 32, 16
    x = jax.random.normal(k_x, (batch, in_features), jnp.float32)
    params = init_godin_params(k_p, in_features, num_classes)

    # training mode -> quotients only (force the Pallas path; heuristic would pick
    # plain XLA for shapes this tiny).
    quot_train = godin_forward(x, *params, training=True, use_pallas=True)
    quot_train = jax.block_until_ready(quot_train)

    # eval mode -> (quotients, numerators, denominators)
    quot_eval, num_eval, den_eval = godin_forward(x, *params, training=False,
                                                  use_pallas=True)
    jax.block_until_ready(quot_eval)

    ref_q_tr, _, _ = godin_reference(x, *params, training=True)
    ref_q_ev, ref_n, ref_d = godin_reference(x, *params, training=False)

    assert quot_train.shape == (batch, num_classes)
    assert quot_eval.shape == (batch, num_classes)
    assert num_eval.shape == (batch, num_classes)
    assert den_eval.shape == (batch, 1)
    assert jnp.allclose(quot_train, ref_q_tr, atol=1e-4, rtol=1e-4)
    assert jnp.allclose(quot_eval, ref_q_ev, atol=1e-4, rtol=1e-4)
    assert jnp.allclose(num_eval, ref_n, atol=1e-4, rtol=1e-4)
    assert jnp.allclose(den_eval, ref_d, atol=1e-5, rtol=1e-5)

    print("KERNEL_OK")
</pallas_src>

<mosaic_0001>
module attributes {stable_mosaic.version = 11 : i64} {
  func.func @_godin_kernel(%arg0: i32, %arg1: i32, %arg2: memref<8x128xf32, #tpu.memory_space<vmem>>, %arg3: memref<128x128xf32, #tpu.memory_space<vmem>>, %arg4: memref<8x1xf32, #tpu.memory_space<vmem>>, %arg5: memref<8x128xf32, #tpu.memory_space<vmem>>, %arg6: memref<8x128xf32, #tpu.memory_space<vmem>>, %arg7: memref<8x1xf32, #tpu.memory_space<vmem>>) attributes {dimension_semantics = [#tpu.dimension_semantics<parallel>, #tpu.dimension_semantics<arbitrary>], iteration_bounds = array<i64: 1, 1>, scalar_prefetch = 0 : i64, scratch_operands = 2 : i64, tpu.core_type = #tpu.core_type<tc>, window_params = [{transform_indices = @transform_0, window_bounds = array<i64: 8, 128>}, {transform_indices = @transform_1, window_bounds = array<i64: 128, 128>}, {transform_indices = @transform_2, window_bounds = array<i64: 8, 1>}, {transform_indices = @transform_3, window_bounds = array<i64: 8, 128>}]} {
    %c0_i32 = arith.constant 0 : i32
    %0 = arith.cmpi eq, %arg1, %c0_i32 : i32
    %1 = arith.extui %0 : i1 to i32
    %c0_i32_0 = arith.constant 0 : i32
    %2 = arith.cmpi ne, %1, %c0_i32_0 : i32
    scf.if %2 {
      %cst_15 = arith.constant 0.000000e+00 : f32
      %18 = vector.broadcast %cst_15 : f32 to vector<8x128xf32>
      %c0_16 = arith.constant 0 : index
      %c0_17 = arith.constant 0 : index
      %19 = vector.load %arg6[%c0_16, %c0_17] : memref<8x128xf32, #tpu.memory_space<vmem>>, vector<8x128xf32>
      tpu.vector_store %arg6[%c0_16, %c0_17], %18 {strides = array<i32>} : memref<8x128xf32, #tpu.memory_space<vmem>>, vector<8x128xf32>,
      %cst_18 = arith.constant 0.000000e+00 : f32
      %20 = vector.broadcast %cst_18 : f32 to vector<8x1xf32>
      %c0_19 = arith.constant 0 : index
      %c0_20 = arith.constant 0 : index
      %21 = vector.load %arg7[%c0_19, %c0_20] : memref<8x1xf32, #tpu.memory_space<vmem>>, vector<8x1xf32>
      tpu.vector_store %arg7[%c0_19, %c0_20], %20 {strides = array<i32>} : memref<8x1xf32, #tpu.memory_space<vmem>>, vector<8x1xf32>,
    } else {
    }
    %c0 = arith.constant 0 : index
    %c0_1 = arith.constant 0 : index
    %3 = vector.load %arg2[%c0, %c0_1] : memref<8x128xf32, #tpu.memory_space<vmem>>, vector<8x128xf32>
    %c0_2 = arith.constant 0 : index
    %c0_3 = arith.constant 0 : index
    %4 = vector.load %arg6[%c0_2, %c0_3] : memref<8x128xf32, #tpu.memory_space<vmem>>, vector<8x128xf32>
    %c0_4 = arith.constant 0 : index
    %c0_5 = arith.constant 0 : index
    %5 = vector.load %arg3[%c0_4, %c0_5] : memref<128x128xf32, #tpu.memory_space<vmem>>, vector<128x128xf32>
    %cst = arith.constant dense<0.000000e+00> : vector<8x128xf32>
    %6 = tpu.matmul %3, %5, %cst {dimension_numbers = #tpu.dot_dimension_numbers<[1], [0], [0], [1], [0, 0, 1, 1], [], []>} : vector<8x128xf32>, vector<128x128xf32>, vector<8x128xf32> -> vector<8x128xf32>
    %7 = arith.addf %4, %6 : vector<8x128xf32>
    %c0_6 = arith.constant 0 : index
    %c0_7 = arith.constant 0 : index
    %8 = vector.load %arg6[%c0_6, %c0_7] : memref<8x128xf32, #tpu.memory_space<vmem>>, vector<8x128xf32>
    tpu.vector_store %arg6[%c0_6, %c0_7], %7 {strides = array<i32>} : memref<8x128xf32, #tpu.memory_space<vmem>>, vector<8x128xf32>,
    %c0_8 = arith.constant 0 : index
    %c0_9 = arith.constant 0 : index
    %9 = vector.load %arg7[%c0_8, %c0_9] : memref<8x1xf32, #tpu.memory_space<vmem>>, vector<8x1xf32>
    %10 = arith.mulf %3, %3 : vector<8x128xf32>
    %cst_10 = arith.constant dense<0.000000e+00> : vector<8xf32>
    %11 = vector.multi_reduction <add>, %10, %cst_10 [1] : vector<8x128xf32> to vector<8xf32>
    %12 = vector.shape_cast %11 : vector<8xf32> to vector<8x1xf32>
    %13 = arith.addf %9, %12 : vector<8x1xf32>
    %c0_11 = arith.constant 0 : index
    %c0_12 = arith.constant 0 : index
    %14 = vector.load %arg7[%c0_11, %c0_12] : memref<8x1xf32, #tpu.memory_space<vmem>>, vector<8x1xf32>
    tpu.vector_store %arg7[%c0_11, %c0_12], %13 {strides = array<i32>} : memref<8x1xf32, #tpu.memory_space<vmem>>, vector<8x1xf32>,
    %c0_i32_13 = arith.constant 0 : i32
    %15 = arith.cmpi eq, %arg1, %c0_i32_13 : i32
    %16 = arith.extui %15 : i1 to i32
    %c0_i32_14 = arith.constant 0 : i32
    %17 = arith.cmpi ne, %16, %c0_i32_14 : i32
    scf.if %17 {
      %c0_15 = arith.constant 0 : index
      %c0_16 = arith.constant 0 : index
      %18 = vector.load %arg7[%c0_15, %c0_16] : memref<8x1xf32, #tpu.memory_space<vmem>>, vector<8x1xf32>
      %19 = math.sqrt %18 : vector<8x1xf32>
      %cst_17 = arith.constant 9.99999974E-5 : f32
      %20 = vector.broadcast %cst_17 : f32 to vector<8x1xf32>
      %21 = arith.addf %19, %20 : vector<8x1xf32>
      %cst_18 = arith.constant 1.000000e+00 : f32
      %22 = vector.broadcast %cst_18 : f32 to vector<8x1xf32>
      %23 = arith.divf %22, %21 : vector<8x1xf32>
      %c0_19 = arith.constant 0 : index
      %c0_20 = arith.constant 0 : index
      %24 = vector.load %arg6[%c0_19, %c0_20] : memref<8x128xf32, #tpu.memory_space<vmem>>, vector<8x128xf32>
      %25 = vector.broadcast %23 : vector<8x1xf32> to vector<8x128xf32>
      %26 = arith.mulf %24, %25 : vector<8x128xf32>
      %c0_21 = arith.constant 0 : index
      %c0_22 = arith.constant 0 : index
      %27 = vector.load %arg4[%c0_21, %c0_22] : memref<8x1xf32, #tpu.memory_space<vmem>>, vector<8x1xf32>
      %28 = vector.broadcast %27 : vector<8x1xf32> to vector<8x128xf32>
      %29 = arith.divf %26, %28 : vector<8x128xf32>
      %c0_23 = arith.constant 0 : index
      %c0_24 = arith.constant 0 : index
      %30 = vector.load %arg5[%c0_23, %c0_24] : memref<8x128xf32, #tpu.memory_space<vmem>>, vector<8x128xf32>
      tpu.vector_store %arg5[%c0_23, %c0_24], %29 {strides = array<i32>} : memref<8x128xf32, #tpu.memory_space<vmem>>, vector<8x128xf32>,
    } else {
    }
    return
  }
  func.func @transform_0(%arg0: i32, %arg1: i32) -> (i32, i32) {
    %c0_i32 = arith.constant 0 : i32
    return %arg0, %arg1 : i32, i32
  }
  func.func @transform_1(%arg0: i32, %arg1: i32) -> (i32, i32) {
    %c0_i32 = arith.constant 0 : i32
    %c0_i32_0 = arith.constant 0 : i32
    return %arg1, %c0_i32 : i32, i32
  }
  func.func @transform_2(%arg0: i32, %arg1: i32) -> (i32, i32) {
    %c0_i32 = arith.constant 0 : i32
    %c0_i32_0 = arith.constant 0 : i32
    return %arg0, %c0_i32 : i32, i32
  }
  func.func @transform_3(%arg0: i32, %arg1: i32) -> (i32, i32) {
    %c0_i32 = arith.constant 0 : i32
    %c0_i32_0 = arith.constant 0 : i32
    return %arg0, %c0_i32 : i32, i32
  }
}

</mosaic_0001>

<bundles_post_ra>
// kernel: godin_forward.1
= control target key start
LH: loop header
LB: loop body
LE: loop exit
PB: predicated region body
PF: predicated region fallthrough
CT: control target
= control target key end

     0   :  { %vm20_vm0 = vcmask 7168   ;;  %v276_v4 = vmov 0.0|0.0   ;;  %v277_v8 = vmov 0.0   ;;  %vm278_vm1 = vmmov 0   ;;  %s369_s0 = inlined_call_operand.vmem [shape: f32[8,128], index: 0, kind: input, shape index: {}]   ;;  %s370_s1 = inlined_call_operand.vmem [shape: f32[128,128], index: 1, kind: input, shape index: {}]   ;;  %s371_s2 = inlined_call_operand.vmem [shape: f32[8,1], index: 2, kind: input, shape index: {}]   ;;  %s372_s3 = inlined_call_operand.hbm [shape: f32[8,128], index: 3, kind: output, shape index: {}]  }
   0x1   :  { %v22_v0 = vld [vmem:[%s369_s0] sm:$0xff]  ;;  %v25_v2 = vld [vmem:[%s370_s1 + $0x8] sm:$0xff]  ;;  %215 = vmatprep.subr.bf16.mxu0 %v276_v4  ;;  %v26_v6 = vld [vmem:[%s370_s1 + $0x10] sm:$0xff]  ;;  %21 = vst.msk [vmem:[#allocation3] sm:$0xff] %vm20_vm0, %v277_v8  ;;  %212 = vmatprep.mubr.msk.f32.mxu0 %vm278_vm1, %v277_v8 }
   0x2   :  { %v24_v1 = vld [vmem:[%s370_s1] sm:$0xff]  ;;  %v113_v3 = vmul.f32 %v22_v0, %v22_v0  ;;  %v27_v7 = vld [vmem:[%s370_s1 + $0x18] sm:$0xff]  ;;  %v29_v11 = vld [vmem:[%s370_s1 + $0x28] sm:$0xff] }
   0x3   :  { %v216_v5 = vpack.c.bf16 %v25_v2, %v24_v1  ;;  %v219_v9 = vpack.c.bf16 %v27_v7, %v26_v6  ;;  %v28_v10 = vld [vmem:[%s370_s1 + $0x20] sm:$0xff] }
   0x4   :  { %114 = vadd.xlane.f32.xlu0 %v113_v3 }
   0x5   :  { %217 = vmatpush3.bf16.msra.mxu0 %v216_v5 }
   0x6   :  { %218 = vmatprep.subr.bf16.mxu0 %v276_v4 }
   0x7   :  { %8 = vsyncpa [#allocation5], 0  ;;  %v222_v12 = vpack.c.bf16 %v29_v11, %v28_v10  ;;  %v30_v13 = vld [vmem:[%s370_s1 + $0x30] sm:$0xff]  ;;  %v31_v14 = vld [vmem:[%s370_s1 + $0x38] sm:$0xff]  ;;  %v279_v24 = vmov 0  }
   0x8   :  { %v225_v15 = vpack.c.bf16 %v31_v14, %v30_v13  ;;  %v32_v16 = vld [vmem:[%s370_s1 + $0x40] sm:$0xff]  ;;  %v33_v17 = vld [vmem:[%s370_s1 + $0x48] sm:$0xff]  ;;  %v34_v19 = vld [vmem:[%s370_s1 + $0x50] sm:$0xff]  ;;  %244 = vset.pattern.permute.xlu0 %v279_v24  ;;  %245 = vset.pattern.permute.xlu1 %v279_v24 }
   0x9   :  { %220 = vmatpush3.bf16.msra.mxu0 %v219_v9  ;;  %v228_v18 = vpack.c.bf16 %v33_v17, %v32_v16  ;;  %v35_v20 = vld [vmem:[%s370_s1 + $0x58] sm:$0xff]  ;;  %v36_v22 = vld [vmem:[%s370_s1 + $0x60] sm:$0xff]  ;;  %v37_v23 = vld [vmem:[%s370_s1 + $0x68] sm:$0xff] }
   0xa   :  { %221 = vmatprep.subr.bf16.mxu0 %v276_v4  ;;  %v231_v21 = vpack.c.bf16 %v35_v20, %v34_v19  ;;  %v140_v25 = vld [vmem:[%s371_s2] sm:$0xff]  ;;  %v234_v26 = vpack.c.bf16 %v37_v23, %v36_v22  ;;  %v38_v27 = vld [vmem:[%s370_s1 + $0x70] sm:$0xff]  ;;  %v39_v28 = vld [vmem:[%s370_s1 + $0x78] sm:$0xff]  ;;  %s280_s1 = smov [#allocation4]  }
   0xb   :  { %v237_v29 = vpack.c.bf16 %v39_v28, %v38_v27  ;;  %v112_v30 = vld [vmem:[#allocation3] sm:$0xff]  ;;  %s155_s2 = sshll.u32 %s280_s1, 4  ;;  %s156_s2 = int_to_ptr.vmem [resolvable:$true] %s155_s2 }
   0xc   :  { %s252_s20 = scalar_lea.vmem %s156_s2, 128  ;;  %p257_p1 = scmp.lt.s32.totalorder %s156_s2, %s156_s2 }
   0xd   :  { %223 = vmatpush3.bf16.msra.mxu0 %v222_v12  ;;  %p253_p0 = scmp.ne.s32.totalorder %s156_s2, %s252_s20  ;;  %p258_p2 = scmp.lt.s32.totalorder %s252_s20, %s252_s20 }
   0xe   :  { %224 = vmatprep.subr.bf16.mxu0 %v276_v4 }
   0xf   :  { %p259_p3 = por %p258_p2, %p257_p1 }
  0x11   :  { %226 = vmatpush3.bf16.msra.mxu0 %v225_v15  ;;  %p260_p4 = pnand %p259_p3, %p253_p0 }
  0x12   :  { %227 = vmatprep.subr.bf16.mxu0 %v276_v4 }
  0x15   :  { %229 = vmatpush3.bf16.msra.mxu0 %v228_v18 }
  0x16   :  { %230 = vmatprep.subr.bf16.mxu0 %v276_v4 }
  0x19   :  { %232 = vmatpush3.bf16.msra.mxu0 %v231_v21 }
  0x1a   :  { %233 = vmatprep.subr.bf16.mxu0 %v276_v4  ;;  %143 = vperm.xlu0 %244, %v140_v25  }
  0x1d   :  { %235 = vmatpush3.bf16.msra.mxu0 %v234_v26 }
  0x1e   :  { %236 = vmatprep.subr.bf16.mxu0 %v276_v4 }
  0x21   :  { %238 = vmatpush3.bf16.msra.mxu0 %v237_v29 }
  0x24   :  { %213 = vmatmul.mubr.f32.vlgmr.msra.gmra.mrb[0].mxu0 %v22_v0 }
  0x91   :  { %v115_v31 = vpop.xlane.xlu0 %114 }
  0x92   :  { %v116_v32 = vadd.f32 %v115_v31, %v112_v30 }
  0x94   :  { %118 = vst.msk [vmem:[#allocation3] sm:$0xff] %vm20_vm0, %v116_v32 }
  0x99   :  { %v144_v43 = vpop.permute.xlu0 %143 }
  0x9b   :  { %v122_v33 = vld [vmem:[#allocation3] sm:$0xff] }
  0x9c   :  { %246 = vrsqrt.f32 %v122_v33  ;;  %vm125_vm2 = vcmp.eq.f32.partialorder %v122_v33, inf  ;;  %v128_v36 = vand.u32 2147483648, %v122_v33  ;;  %vm127_vm3 = vcmp.eq.f32.partialorder %v122_v33, 0.0 }
  0xa6   :  { %v247_v34 = vpop.eup %246 }
  0xa7   :  { %v124_v35 = vmul.f32 %v247_v34, %v122_v33 }
  0xa9   :  { %v126_v37 = vsel %vm125_vm2, %v122_v33, %v124_v35 }
  0xaa   :  { %v129_v38 = vsel %vm127_vm3, %v128_v36, %v126_v37 }
  0xab   :  { %v130_v39 = vadd.f32 0.0001, %v129_v38 }
  0xad   :  { %248 = vrcp.f32 %v130_v39 }
  0xae   :  { %250 = vrcp.f32 %v144_v43 }
  0xb7   :  { %v249_v40 = vpop.eup %248 }
  0xb8   :  { %136 = vperm.xlu1 %245, %v249_v40   ;;  %v251_v44 = vpop.eup %250 }
  0xf7   :  { %v106_v41 = vpop.f32.mrb[0].mxu0 }
  0xf8   :  { %v214_v42 = vpop.f32.mrb[1].mxu0 }
 0x137   :  { %v137_v45 = vpop.permute.xlu1 %136 }
 0x138   :  { %v139_v46 = vmul.f32 %v137_v45, %v106_v41 }
 0x13a   :  { %v147_v47 = vmul.f32 %v251_v44, %v139_v46 }
 0x13c   :  { %148 = vst [vmem:[#allocation4] sm:$0xff] %v147_v47 }
 0x13d   :  { %263 = shalt.err (!%p260_p4)
}
 0x13e   :  { %s264_s22 = scalar_lea.hbm %s372_s3, 128 }
 0x13f   :  { %p265_p5 = scmp.ne.s32.totalorder %s372_s3, %s264_s22  ;;  %p268_p6 = scmp.lt.u32.totalorder %s264_s22, %s372_s3 }
 0x141   :  { %p270_p7 = pnand %p268_p6, %p265_p5 }
 0x143   :  { %273 = shalt.err (!%p270_p7)
}
 0x144   :  { %158 = dma.vmem_to_hbm [thread:$0]  %s156_s2, 128, %s372_s3, [#allocation5]  }
 0x145   :  { %274 = dma.done.wait [#allocation5], 128  }
 0x146   :  { %275 = vsyncadd [#allocation5], 4294967168 }
 0x147   :  { %162 = vsyncpa [#allocation5], 1 }

</bundles_post_ra>
